<compile_context>
chip_gen: v7x
topology: tpu7x:2x2x1
jax: 0.10.0
libtpu: 0.0.40
codegen_flags: <defaults>
</compile_context>

<pallas_src>
import functools

import jax
import jax.numpy as jnp
from jax.experimental import pallas as pl
from jax.experimental.pallas import tpu as pltpu


_MIN_STEP_BYTES = 1 << 20          # don't split work below ~1 MiB per grid step


def _round_up(x, m):
    return ((x + m - 1) // m) * m


def _vmem_limit_bytes():
    """Scoped-VMEM request derived from the actual chip, with headroom."""
    try:
        cap = getattr(pltpu.get_tpu_info(), "vmem_capacity_bytes", None)
    except Exception:
        cap = None
    cap = int(cap) if cap else 64 * 1024 * 1024     # conservative: v7x per-core
    return min((cap * 3) // 4, 100 * 1024 * 1024)


def _step_bytes(nb, rows_out, H, W, Wo, itemsize):
    """Honest per-grid-step VMEM estimate (double buffering + f32 temps)."""
    rows_in = min(rows_out + 2, H)
    return (2 * nb * rows_in * W * itemsize           # input block, double-buffered
            + 2 * nb * 8 * W * itemsize               # 8-row halo block
            + 2 * nb * 2 * rows_out * Wo * itemsize   # output block, double-buffered
            + 8 * nb * rows_in * W * 4)               # f32 working copy + shifted temps


def _plan(N, H, W, itemsize, budget):
    """Pick (images-per-step nb, output-rows-per-step ro)."""
    Ho, Wo = H - 2, W - 2
    fits = lambda nb, ro: _step_bytes(nb, ro, H, W, Wo, itemsize) <= budget
    big = lambda nb, ro: _step_bytes(nb, ro, H, W, Wo, itemsize) >= _MIN_STEP_BYTES

    if fits(1, Ho):
        # Whole-image blocks; nb from divisors of N so no batch padding/waste.
        divisors = [d for d in range(1, N + 1) if N % d == 0 and fits(d, Ho)]
        nb = next((d for d in sorted(divisors, reverse=True)
                   if N // d >= 4 and big(d, Ho)), None)
        if nb is None:  # keep >=2 steps (both megacore TCs busy) when N allows
            nb = next((d for d in sorted(divisors, reverse=True) if N // d >= 2),
                      max(divisors))
        ro = Ho
        # Too few batch steps (e.g. N == 1): split rows for pipelining / the
        # second v7x TensorCore, while each step stays >= ~1 MiB.
        if N // nb < 4:
            splits = pl.cdiv(4, N // nb)
            cand = _round_up(pl.cdiv(Ho, splits), 8)
            if 8 <= cand < Ho and big(nb, cand):
                ro = cand
        return nb, ro

    # Whole image does not fit VMEM: one image per step, largest row block
    # (multiple of 8, with a 2-row halo) that fits the budget.
    ro = 8
    while ro + 8 < Ho and fits(1, ro + 8):
        ro += 8
    return 1, ro


def _sobel_core(x, ho, wo):
    """Separable Sobel on x: (nb, rows >= ho+2, cols >= wo+2) -> f32 (gx, gy)."""
    left = x[:, :, 0:wo]
    mid = x[:, :, 1:1 + wo]
    right = x[:, :, 2:2 + wo]
    d = (right - left).astype(jnp.float32)             # horizontal difference -> gx
    s = (left + 2 * mid + right).astype(jnp.float32)   # horizontal smoothing  -> gy
    # sobel_x = [[-1,0,1],[-2,0,2],[-1,0,1]]  (cross-correlation, like nn.Conv2d)
    gx = d[:, 0:ho] + 2.0 * d[:, 1:1 + ho] + d[:, 2:2 + ho]
    # sobel_y = [[1,2,1],[0,0,0],[-1,-2,-1]]
    gy = s[:, 0:ho] - s[:, 2:2 + ho]
    return gx, gy


def _sobel_whole_kernel(x_ref, o_ref, *, work_dtype):
    # x_ref: (nb, 1, H, W) ; o_ref: (nb, 2, H-2, W-2).
    x = x_ref[:, 0].astype(work_dtype)                  # (nb, H, W)
    ho, wo = o_ref.shape[2], o_ref.shape[3]
    gx, gy = _sobel_core(x, ho, wo)
    o_ref[:, 0] = gx.astype(o_ref.dtype)                # direct channel stores,
    o_ref[:, 1] = gy.astype(o_ref.dtype)                # no jnp.stack temporary


def _sobel_rows_kernel(x_ref, halo_ref, o_ref, *, work_dtype):
    # x_ref:    (nb, 1, Ro, W)  rows [r*Ro, r*Ro+Ro)
    # halo_ref: (nb, 1, 8, W)   the next 8 input rows (clamped near the bottom)
    # o_ref:    (nb, 2, Ro, Wo)
    x = jnp.concatenate([x_ref[:, 0], halo_ref[:, 0, 0:2]],
                        axis=1).astype(work_dtype)      # (nb, Ro+2, W)
    ho, wo = o_ref.shape[2], o_ref.shape[3]
    gx, gy = _sobel_core(x, ho, wo)
    o_ref[:, 0] = gx.astype(o_ref.dtype)
    o_ref[:, 1] = gy.astype(o_ref.dtype)


def sobel_forward(img, *, row_block=None):
    """Pallas equivalent of Sobel.forward(img) for NCHW input with C == 1.

    `row_block` (multiple of 8) forces the row-tiled halo path; mainly for tests.
    """
    N, C, H, W = img.shape
    assert C == 1, "Sobel expects a single input channel"
    assert H >= 3 and W >= 3, "Sobel needs at least a 3x3 image"
    Ho, Wo = H - 2, W - 2

    vmem_limit = _vmem_limit_bytes()
    budget = (vmem_limit * 4) // 5                 # headroom for compiler scratch

    if row_block is not None:
        nb, ro = 1, _round_up(max(int(row_block), 8), 8)
    else:
        nb, ro = _plan(N, H, W, jnp.dtype(img.dtype).itemsize, budget)
    row_tiled = ro < Ho

    # bf16 horizontal pass for bf16 inputs (v6e/v7x); f32 accumulation.
    work_dtype = jnp.bfloat16 if img.dtype == jnp.bfloat16 else jnp.float32

    out_shape = jax.ShapeDtypeStruct((N, 2, Ho, Wo), img.dtype)
    params = pltpu.CompilerParams(
        dimension_semantics=("parallel",) * (2 if row_tiled else 1),
        vmem_limit_bytes=vmem_limit,
    )

    if not row_tiled:
        return pl.pallas_call(
            functools.partial(_sobel_whole_kernel, work_dtype=work_dtype),
            out_shape=out_shape,
            grid=(N // nb,),
            in_specs=[pl.BlockSpec((nb, 1, H, W), lambda b: (b, 0, 0, 0))],
            out_specs=pl.BlockSpec((nb, 2, Ho, Wo), lambda b: (b, 0, 0, 0)),
            compiler_params=params,
        )(img)

    nrb = pl.cdiv(Ho, ro)          # row blocks per image
    nh8 = pl.cdiv(H, 8)            # 8-row blocks in the input height
    rpb = ro // 8                  # 8-row blocks per main row block

    def block_map(b, r):
        return (b, 0, r, 0)

    def halo_map(b, r):
        # First 8 input rows after this block's rows; clamp so the DMA start
        # stays in bounds (clamped rows only feed masked-off output rows).
        return (b, 0, jnp.minimum((r + 1) * rpb, nh8 - 1), 0)

    return pl.pallas_call(
        functools.partial(_sobel_rows_kernel, work_dtype=work_dtype),
        out_shape=out_shape,
        grid=(N // nb, nrb),
        in_specs=[pl.BlockSpec((nb, 1, ro, W), block_map),
                  pl.BlockSpec((nb, 1, 8, W), halo_map)],
        out_specs=pl.BlockSpec((nb, 2, ro, Wo), block_map),
        compiler_params=params,
    )(img, img)


def _reference_sobel(img):
    # Plain-JAX reference using lax.conv (cross-correlation like nn.Conv2d).
    sobel_x = jnp.array([[[-1., 0., 1.], [-2., 0., 2.], [-1., 0., 1.]]],
                        dtype=jnp.float32)
    sobel_y = jnp.array([[[1., 2., 1.], [0., 0., 0.], [-1., -2., -1.]]],
                        dtype=jnp.float32)
    w = jnp.stack([sobel_x, sobel_y])              # (2, 1, 3, 3)  OIHW
    return jax.lax.conv_general_dilated(
        img.astype(jnp.float32), w, window_strides=(1, 1), padding="VALID",
        dimension_numbers=("NCHW", "OIHW", "NCHW")).astype(img.dtype)


if __name__ == "__main__":
    k1, k2 = jax.random.split(jax.random.PRNGKey(0))

    # 1) Whole-image path: small NCHW input consistent with Conv2d(1, 2, 3).
    x1 = jax.random.normal(k1, (2, 1, 16, 16), dtype=jnp.float32)
    out1 = jax.block_until_ready(sobel_forward(x1))
    ref1 = jax.block_until_ready(_reference_sobel(x1))
    assert out1.shape == (2, 2, 14, 14)
    assert jnp.allclose(out1, ref1, atol=1e-5, rtol=1e-5)

    # 2) Row-tiled path with the 2-row halo (forced small row block).
    x2 = jax.random.normal(k2, (1, 1, 32, 20), dtype=jnp.float32)
    out2 = jax.block_until_ready(sobel_forward(x2, row_block=8))
    ref2 = jax.block_until_ready(_reference_sobel(x2))
    assert out2.shape == (1, 2, 30, 18)
    assert jnp.allclose(out2, ref2, atol=1e-5, rtol=1e-5)

    print("KERNEL_OK")
</pallas_src>

<mosaic_0001>
module attributes {stable_mosaic.version = 11 : i64} {
  func.func @_sobel_whole_kernel(%arg0: i32, %arg1: memref<1x1x16x16xf32, #tpu.memory_space<vmem>>, %arg2: memref<1x2x14x14xf32, #tpu.memory_space<vmem>>) attributes {dimension_semantics = [#tpu.dimension_semantics<parallel>], iteration_bounds = array<i64: 2>, scalar_prefetch = 0 : i64, scratch_operands = 0 : i64, tpu.core_type = #tpu.core_type<tc>, window_params = [{transform_indices = @transform_0, window_bounds = array<i64: 1, 1, 16, 16>}, {transform_indices = @transform_1, window_bounds = array<i64: 1, 2, 14, 14>}]} {
    %c0 = arith.constant 0 : index
    %c0_0 = arith.constant 0 : index
    %c0_1 = arith.constant 0 : index
    %c0_2 = arith.constant 0 : index
    %0 = vector.load %arg1[%c0, %c0_0, %c0_1, %c0_2] : memref<1x1x16x16xf32, #tpu.memory_space<vmem>>, vector<1x1x16x16xf32>
    %1 = vector.shape_cast %0 : vector<1x1x16x16xf32> to vector<1x16x16xf32>
    %2 = vector.extract_strided_slice %1 {offsets = [0, 0, 0], sizes = [1, 16, 14], strides = [1, 1, 1]} : vector<1x16x16xf32> to vector<1x16x14xf32>
    %3 = vector.extract_strided_slice %1 {offsets = [0, 0, 1], sizes = [1, 16, 14], strides = [1, 1, 1]} : vector<1x16x16xf32> to vector<1x16x14xf32>
    %4 = vector.extract_strided_slice %1 {offsets = [0, 0, 2], sizes = [1, 16, 14], strides = [1, 1, 1]} : vector<1x16x16xf32> to vector<1x16x14xf32>
    %5 = arith.subf %4, %2 : vector<1x16x14xf32>
    %cst = arith.constant 2.000000e+00 : f32
    %6 = vector.broadcast %cst : f32 to vector<1x16x14xf32>
    %7 = arith.mulf %6, %3 : vector<1x16x14xf32>
    %8 = arith.addf %2, %7 : vector<1x16x14xf32>
    %9 = arith.addf %8, %4 : vector<1x16x14xf32>
    %10 = vector.extract_strided_slice %5 {offsets = [0, 0, 0], sizes = [1, 14, 14], strides = [1, 1, 1]} : vector<1x16x14xf32> to vector<1x14x14xf32>
    %11 = vector.extract_strided_slice %5 {offsets = [0, 1, 0], sizes = [1, 14, 14], strides = [1, 1, 1]} : vector<1x16x14xf32> to vector<1x14x14xf32>
    %cst_3 = arith.constant 2.000000e+00 : f32
    %12 = vector.broadcast %cst_3 : f32 to vector<1x14x14xf32>
    %13 = arith.mulf %12, %11 : vector<1x14x14xf32>
    %14 = arith.addf %10, %13 : vector<1x14x14xf32>
    %15 = vector.extract_strided_slice %5 {offsets = [0, 2, 0], sizes = [1, 14, 14], strides = [1, 1, 1]} : vector<1x16x14xf32> to vector<1x14x14xf32>
    %16 = arith.addf %14, %15 : vector<1x14x14xf32>
    %17 = vector.extract_strided_slice %9 {offsets = [0, 0, 0], sizes = [1, 14, 14], strides = [1, 1, 1]} : vector<1x16x14xf32> to vector<1x14x14xf32>
    %18 = vector.extract_strided_slice %9 {offsets = [0, 2, 0], sizes = [1, 14, 14], strides = [1, 1, 1]} : vector<1x16x14xf32> to vector<1x14x14xf32>
    %19 = arith.subf %17, %18 : vector<1x14x14xf32>
    %c0_4 = arith.constant 0 : index
    %c0_5 = arith.constant 0 : index
    %c0_6 = arith.constant 0 : index
    %c0_7 = arith.constant 0 : index
    %20 = vector.load %arg2[%c0_4, %c0_5, %c0_6, %c0_7] : memref<1x2x14x14xf32, #tpu.memory_space<vmem>>, vector<1x1x14x14xf32>
    %21 = vector.shape_cast %20 : vector<1x1x14x14xf32> to vector<1x14x14xf32>
    %22 = vector.shape_cast %16 : vector<1x14x14xf32> to vector<1x1x14x14xf32>
    tpu.vector_store %arg2[%c0_4, %c0_5, %c0_6, %c0_7], %22 {strides = array<i32>} : memref<1x2x14x14xf32, #tpu.memory_space<vmem>>, vector<1x1x14x14xf32>,
    %c0_8 = arith.constant 0 : index
    %c1 = arith.constant 1 : index
    %c0_9 = arith.constant 0 : index
    %c0_10 = arith.constant 0 : index
    %23 = vector.load %arg2[%c0_8, %c1, %c0_9, %c0_10] : memref<1x2x14x14xf32, #tpu.memory_space<vmem>>, vector<1x1x14x14xf32>
    %24 = vector.shape_cast %23 : vector<1x1x14x14xf32> to vector<1x14x14xf32>
    %25 = vector.shape_cast %19 : vector<1x14x14xf32> to vector<1x1x14x14xf32>
    tpu.vector_store %arg2[%c0_8, %c1, %c0_9, %c0_10], %25 {strides = array<i32>} : memref<1x2x14x14xf32, #tpu.memory_space<vmem>>, vector<1x1x14x14xf32>,
    return
  }
  func.func @transform_0(%arg0: i32) -> (i32, i32, i32, i32) {
    %c0_i32 = arith.constant 0 : i32
    %c0_i32_0 = arith.constant 0 : i32
    %c0_i32_1 = arith.constant 0 : i32
    %c0_i32_2 = arith.constant 0 : i32
    return %arg0, %c0_i32, %c0_i32_0, %c0_i32_1 : i32, i32, i32, i32
  }
  func.func @transform_1(%arg0: i32) -> (i32, i32, i32, i32) {
    %c0_i32 = arith.constant 0 : i32
    %c0_i32_0 = arith.constant 0 : i32
    %c0_i32_1 = arith.constant 0 : i32
    %c0_i32_2 = arith.constant 0 : i32
    return %arg0, %c0_i32, %c0_i32_0, %c0_i32_1 : i32, i32, i32, i32
  }
}

</mosaic_0001>

<bundles_post_ra>
// kernel: tpu_custom_call.1
= control target key start
LH: loop header
LB: loop body
LE: loop exit
PB: predicated region body
PF: predicated region fallthrough
CT: control target
= control target key end

     0   :  { %6 = vsyncpa [#allocation3], 0  ;;  %s536_s0 = inlined_call_operand.hbm [shape: f32[2,1,16,16], index: 0, kind: input, shape index: {}]   ;;  %s537_s1 = inlined_call_operand.vmem [shape: f32[2,2,14,14], index: 1, kind: output, shape index: {}]  }
   0x1   :  { %8 = vsyncpa [#allocation3 + $0x1], 0  ;;  %s424_s6 = smov 0   ;;  %s426_s7 = smov 0  }
   0x2   :  { %s428_s8 = smov 0   ;;  %s430_s9 = smov 0  }
   0x3 LB: > { %s443_s10 = sadd.s32 4294967295, %s406_s9   ;;  %s446_s11 = sadd.s32 1, %s406_s9   ;;  %s406_s9 = sphi %s430_s9, %s544_s9   ;;  %s402_s8 = sphi %s428_s8, %s543_s8   ;;  %s398_s7 = sphi %s426_s7, %s542_s7   ;;  %s394_s6 = sphi %s424_s6, %s541_s6  }
   0x4   : > { %s18_s12 = ssub.s32 %s406_s9, %s446_s11  ;;  %s21_s13 = sadd.s32 1, %s402_s8 }
   0x5   : > { %p19_p0 = scmp.eq.s32.totalorder %s18_s12, 0  ;;  %p28_p1 = scmp.ne.s32.totalorder %s402_s8, %s398_s7 }
   0x6   : > { %p29_p2 = scmp.eq.s32.totalorder %s406_s9, 0  ;;  %p34_p3 = scmp.ne.s32.totalorder %s398_s7, %s394_s6 }
   0x7   : > { %s456_s14 = scalar_select %p19_p0, %s402_s8, %s21_s13  }
   0x8   : > { %p30_p4 = por %p29_p2, %p28_p1  ;;  %p35_p5 = scmp.eq.s32.totalorder %s443_s10, 0 }
   0x9   : > { %p304_p6 = scmp.lt.s32.totalorder %s406_s9, 2  ;;  %s84_s16 = sand.u32 1, %s402_s8  }
   0xa   : > { %p460_p7 = por %p35_p5, %p34_p3  ;;  %s285_s17 = sshll.u32 %s84_s16, 4 }
   0xb   : > { %s296_s18 = sshll.u32 %s406_s9, 8  ;;  %s88_s22 = scalar_lea.vmem [#allocation2], %s285_s17 }
   0xc   : > { %s469_s21 = scalar_lea.hbm %s536_s0, %s296_s18  ;;  %s95_s23 = sshll.u32 %s88_s22, 4  ;;  %s471_s23 = int_to_ptr.vmem [resolvable:$true] %s95_s23 }
   0xd   : > { %p473_p8 = pnand %p304_p6, %p30_p4  ;;  %s478_s25 = scalar_lea.sflag [#allocation3], %s84_s16 }
   0xe   : > { %s342_s26 = scalar_lea.hbm %s469_s21, 256  ;;  %s347_s29 = scalar_lea.hbm %s536_s0, 512 }
   0xf   : > { %p343_p10 = scmp.ne.s32.totalorder %s469_s21, %s342_s26  ;;  %p344_p11 = pneg %p473_p8 }
  0x10   : > { %p348_p0 = scmp.lt.u32.totalorder %s469_s21, %s536_s0  ;;  %p349_p1 = scmp.lt.u32.totalorder %s347_s29, %s342_s26 }
  0x11   : > { %p345_p12 = pnand %p344_p11, %p343_p10  ;;  %p351_p3 = scmp.lt.u32.totalorder %s342_s26, %s469_s21 }
  0x12   : > { %p350_p2 = por %p349_p1, %p348_p0 }
  0x13   : > { %p346_p13 = pneg %p345_p12 }
  0x14   : > { %p352_p4 = por %p351_p3, %p350_p2 }
  0x16   : > { %p353_p5 = pnand %p352_p4, %p346_p13 }
  0x18   : > { %356 = shalt.err (!%p353_p5)
}
  0x19   : > { %s357_s3 = scalar_lea.vmem %s471_s23, 256  ;;  %s408_s4 = smov [#allocation2]  }
  0x1a   : > { %p358_p6 = scmp.ne.s32.totalorder %s471_s23, %s357_s3  ;;  %s362_s5 = sshll.u32 %s408_s4, 4  ;;  %s363_s5 = int_to_ptr.vmem [resolvable:$false] %s362_s5 }
  0x1b   : > { %s364_s6 = scalar_lea.vmem %s363_s5, 512  ;;  %p365_p9 = scmp.lt.s32.totalorder %s471_s23, %s363_s5 }
  0x1c   : > { %p360_p10 = pnand %p358_p6, %p344_p11  ;;  %p366_p0 = scmp.lt.s32.totalorder %s364_s6, %s357_s3 }
  0x1e   : > { %p361_p12 = pneg %p360_p10  ;;  %p367_p1 = por %p366_p0, %p365_p9 }
  0x20   : > { %p368_p2 = pnand %p367_p1, %p361_p12 }
  0x22   : > { %371 = shalt.err (!%p368_p2)
}
  0x23   : > { %s409_s12 = smov 128   ;;  %s410_s13 = smov 8  }
  0x24   : > { %303 = dma.hbm_to_vmem [thread:$0]  (!%p473_p8), %s469_s21, 256, %s471_s23, %s478_s25, %s409_s12, %s409_s12, %s410_s13  }
  0x25   : > { %p103_p11 = scmp.lt.s32.totalorder %s406_s9, 3  ;;  %p540_p13 = scmp.ge.s32.totalorder %s406_s9, 1 }
  0x27   : > { %p104_p3 = pnand %p540_p13, %p103_p11 }
  0x28   : > { %s109_s16 = sand.u32 (!%p104_p3), 1, %s398_s7  }
  0x29   : > { %107 = sbr.rel (%p104_p3) target bundleno = 296 (0x128), region = 24  ;;  %s289_s17 = sshll.u32 (!%p104_p3), %s109_s16, 4 }
  0x2a   : > { %s110_s18 = scalar_lea.sflag (!%p104_p3), [#allocation3], %s109_s16  ;;  %s113_s19 = scalar_lea.vmem (!%p104_p3), [#allocation2], %s289_s17 }
  0x30   : > { %389 = dma.done.wait (%p460_p7), %s110_s18, 256  }
  0x31   : > { %391 = vsyncadd (%p460_p7), %s110_s18, 4294967040  ;;  %v137_v0 = vld [vmem:[%s113_s19] sm:$0xff]  ;;  %s411_s20 = smov 2   ;;  %v138_v2 = vld [vmem:[%s113_s19 + $0x8] sm:$0xff]  ;;  %s412_s9 = smov 127   ;;  %vm173_vm0 = vcmask 1046528  }
  0x32   : > { %141 = vrot.lane.b32.xlu0 %v137_v0, %s411_s20  ;;  %v149_v1 = vmul.f32 2.0, %v137_v0  ;;  %v150_v3 = vmul.f32 2.0, %v138_v2  ;;  %s413_s21 = smov 126   ;;  %p132_p7 = scmp.lt.s32.totalorder %s443_s10, 1  ;;  %vm183_vm1 = vcmask 1045504   ;;  %vm210_vm2 = vcmask 111616  }
  0x33   : > { %vm208_vm3 = vcmask 113664  }
  0x34   : > { %153 = vrot.lane.b32.xlu1 %v149_v1, %s412_s9  ;;  %s546_s10 = smov (!%p132_p7, %s443_s10), 1 }
  0x35   : > { %s297_s15 = sshll.u32 %s546_s10, 5 }
  0x36   : > { %143 = vrot.lane.b32.xlu0 %v138_v2, %s411_s20  ;;  %s136_s24 = scalar_lea.vmem %s537_s1, %s297_s15 }
  0x38   : > { %155 = vrot.lane.b32.xlu1 %v150_v3, %s412_s9 }
  0x3a   : > { %161 = vrot.lane.b32.xlu0 %v137_v0, %s413_s21 }
  0x3c   : > { %163 = vrot.lane.b32.xlu1 %v138_v2, %s413_s21 }
  0xa4   : > { %v142_v4 = vpop.permute.xlu0 %141 }
  0xa5   : > { %v147_v5 = vsub.f32 %v137_v0, %v142_v4 }
  0xa6   : > { %v154_v6 = vpop.permute.xlu1 %153 }
  0xa7   : > { %v169_v8 = vmul.f32 2.0, %v147_v5  ;;  %v159_v10 = vadd.f32 %v154_v6, %v137_v0  ;;  %v184_v19 = vrot.slane %v147_v5, 2 }
  0xa8   : > { %v144_v7 = vpop.permute.xlu0 %143 }
  0xa9   : > { %v148_v9 = vsub.f32 %v138_v2, %v144_v7  ;;  %v174_v15 = vrot.slane %v169_v8, 1 }
  0xaa   : > { %v156_v11 = vpop.permute.xlu1 %155 }
  0xab   : > { %v170_v12 = vmul.f32 2.0, %v148_v9  ;;  %v160_v13 = vadd.f32 %v156_v11, %v138_v2  ;;  %v185_v17 = vrot.slane %v148_v9, 2 }
  0xac   : > { %v162_v14 = vpop.permute.xlu0 %161 }
  0xad   : > { %v175_v16 = vrot.slane %v170_v12, 1  ;;  %v167_v18 = vadd.f32 %v162_v14, %v159_v10  ;;  %v186_v27 = vsel %vm183_vm1, %v184_v19, %v185_v17 }
  0xae   : > { %v164_v20 = vpop.permute.xlu1 %163 }
  0xaf   : > { %v180_v21 = vadd.f32 %v175_v16, %v148_v9  ;;  %v176_v22 = vsel %vm173_vm0, %v174_v15, %v175_v16  ;;  %v193_v23 = vrot.slane %v167_v18, 2  ;;  %v168_v24 = vadd.f32 %v164_v20, %v160_v13 }
  0xb0   : > { %v179_v25 = vadd.f32 %v176_v22, %v147_v5 }
  0xb1   : > { %v190_v26 = vadd.f32 %v185_v17, %v180_v21  ;;  %v194_v28 = vrot.slane %v168_v24, 2 }
  0xb2   : > { %v189_v29 = vadd.f32 %v186_v27, %v179_v25 }
  0xb3   : > { %204 = vrot.lane.b32.xlu1 %v190_v26, %s413_s21  ;;  %v195_v30 = vsel %vm183_vm1, %v193_v23, %v194_v28  ;;  %v199_v31 = vsub.f32 %v168_v24, %v194_v28 }
  0xb4   : > { %202 = vrot.lane.b32.xlu0 %v189_v29, %s413_s21  ;;  %v198_v32 = vsub.f32 %v167_v18, %v195_v30 }
  0xb5   : > { %293 = vst.msk [vmem:[%s136_s24 + $0x18] sm:$0x3f] %vm210_vm2, %v199_v31 }
  0xb6   : > { %292 = vst.msk [vmem:[%s136_s24 + $0x10] sm:$0xff] %vm208_vm3, %v198_v32 }
 0x125   : > { %v205_v33 = vpop.permute.xlu1 %204 }
 0x126   : > { %211 = vst.msk [vmem:[%s136_s24 + $0x8] sm:$0x3f] %vm210_vm2, %v205_v33  ;;  %v203_v34 = vpop.permute.xlu0 %202 }
 0x127   : > { %209 = vst.msk [vmem:[%s136_s24] sm:$0xff] %vm208_vm3, %v203_v34 }
 0x128 PF: > { %p11_p8 = scmp.ge.s32.totalorder %s446_s11, 4   ;;  %s541_s6 = smov %s398_s7 }
 0x129   : > { %s542_s7 = smov %s402_s8  ;;  %s543_s8 = smov %s456_s14 }
 0x12a   : > { %s544_s9 = smov %s446_s11  ;;  %13 = sbr.rel (!%p11_p8) target bundleno = 3 (0x3), region = 65 }
 0x131   :  { %236 = vsyncpa [#allocation3], 1 }
 0x132   :  { %238 = vsyncpa [#allocation3 + $0x1], 1 }

</bundles_post_ra>
